<compile_context>
chip_gen: v5e
topology: v5e:2x2
jax: 0.10.0
libtpu: 0.0.40
codegen_flags: <defaults>
</compile_context>

<pallas_src>
import jax
import jax.numpy as jnp
from jax import lax
from jax.experimental import pallas as pl
from jax.experimental.pallas import tpu as pltpu

NUM_NEURONS = 20
IN_FEATURES = 20
OUT_FEATURES = 2
TILE_B = 8192  # preferred batch tile (multiple of 128)


def _round_up(n, m):
    return (n + m - 1) // m * m


def _pick_tile_b(B, preferred=TILE_B):
    """Pick the batch tile.

    - Small B: one full-array block (block dims == array dims, no padding, no
      alignment constraints).
    - Large B: multiple-of-128 tile, capped so there are >= 2 grid steps
      (lets dimension_semantics=("parallel",) shard across v7x's 2 TCs).
    """
    if B <= 1024:
        return B
    two_way = _round_up((B + 1) // 2, 128)
    return min(preferred, two_way)


def _mlp_kernel(x_ref, w0_ref, b0_ref, w1_ref, b1_ref, w2_ref, b2_ref, o_ref):
    # x: (TILE_B, IN_FEATURES) -- native row-major batch tile.
    x = x_ref[...]

    # dense0 + ReLU : contract the shared last (feature) axis of (H,20) and
    # (TB,20) -> (H, TB).  Lane-dense batch-on-lanes intermediates from here on.
    h0 = lax.dot_general(w0_ref[...], x, (((1,), (1,)), ((), ())),
                         preferred_element_type=jnp.float32)
    h0 = jnp.maximum(h0 + b0_ref[...], 0.0)           # bias (H, 1) broadcasts over lanes

    # TODO(synk): nn.Dropout(0.1) is identity in eval/inference mode; training-mode
    # stochastic masking (pltpu.prng_random_bits) intentionally not applied here.

    # dense1 + ReLU :  (H, H) @ (H, TB) -> (H, TB)
    h1 = jnp.dot(w1_ref[...], h0, preferred_element_type=jnp.float32)
    h1 = jnp.maximum(h1 + b1_ref[...], 0.0)

    # output :  (2, H) @ (H, TB) -> (2, TB)
    logits = jnp.dot(w2_ref[...], h1, preferred_element_type=jnp.float32)
    logits = logits + b2_ref[...]

    # 2-class softmax == symmetric sigmoids of the logit difference (exact):
    #   p0 = 1/(1+exp(l1-l0)),  p1 = 1/(1+exp(l0-l1))
    # No XLU cross-lane reductions; exp goes to the EUP slot. Sliced sublane
    # stores avoid a concatenate/relayout of the (2, TB) result.
    d = logits[1:2, :] - logits[0:1, :]               # (1, TB)
    p1 = 1.0 / (1.0 + jnp.exp(-d))
    p0 = 1.0 / (1.0 + jnp.exp(d))
    o_ref[0:1, :] = p0.astype(o_ref.dtype)
    o_ref[1:2, :] = p1.astype(o_ref.dtype)


def my_neural_net_forward(x, params, tile_b=None):
    """x: (B, 20) float32.  params: PyTorch-native (out, in) weights, (out, 1) biases."""
    B = x.shape[0]
    w0, b0, w1, b1, w2, b2 = (
        params["w0"], params["b0"], params["w1"],
        params["b1"], params["w2"], params["b2"],
    )

    tb = _pick_tile_b(B, tile_b if tile_b is not None else TILE_B)
    grid = (pl.cdiv(B, tb),)

    # Weights/biases: full-array blocks with a constant index map -> stay
    # VMEM-resident across all batch-grid steps.
    resident = lambda a: pl.BlockSpec(a.shape, lambda i: (0, 0))

    outT = pl.pallas_call(
        _mlp_kernel,
        out_shape=jax.ShapeDtypeStruct((OUT_FEATURES, B), jnp.float32),
        grid=grid,
        in_specs=[
            # Native-layout contiguous batch tile: (tile_b, 20) rows per step.
            pl.BlockSpec((tb, IN_FEATURES), lambda i: (i, 0)),
            resident(w0), resident(b0),
            resident(w1), resident(b1),
            resident(w2), resident(b2),
        ],
        # Lane-dense output (2, tile_b): unmasked vector stores.
        out_specs=pl.BlockSpec((OUT_FEATURES, tb), lambda i: (0, i)),
        compiler_params=pltpu.CompilerParams(
            dimension_semantics=("parallel",)),
    )(x, w0, b0, w1, b1, w2, b2)

    return outT.T                                      # (B, 2); tiny 8*B-byte transpose


def init_params(key, num_neurons=NUM_NEURONS):
    """Deterministic init mimicking PyTorch Linear default (uniform +/- 1/sqrt(fan_in)).
    Weights stored PyTorch-native (out_features, in_features); biases (out_features, 1)."""
    k0, k1, k2, k3, k4, k5 = jax.random.split(key, 6)

    def linear(kw, kb, fan_in, fan_out):
        bound = 1.0 / jnp.sqrt(jnp.float32(fan_in))
        w = jax.random.uniform(kw, (fan_out, fan_in), jnp.float32, -bound, bound)
        b = jax.random.uniform(kb, (fan_out, 1), jnp.float32, -bound, bound)
        return w, b

    w0, b0 = linear(k0, k1, IN_FEATURES, num_neurons)
    w1, b1 = linear(k2, k3, num_neurons, num_neurons)
    w2, b2 = linear(k4, k5, num_neurons, OUT_FEATURES)
    return {"w0": w0, "b0": b0, "w1": w1, "b1": b1, "w2": w2, "b2": b2}


def _reference_forward(x, p):
    h0 = jnp.maximum(x @ p["w0"].T + p["b0"].T, 0.0)
    h1 = jnp.maximum(h0 @ p["w1"].T + p["b1"].T, 0.0)
    return jax.nn.softmax(h1 @ p["w2"].T + p["b2"].T, axis=-1)


if __name__ == "__main__":
    key = jax.random.PRNGKey(0)
    k_x, k_x2, k_x3, k_p = jax.random.split(key, 4)
    params = init_params(k_p)

    # Small-shape check (single full-array block, no padding).
    B = 8
    x = jax.random.normal(k_x, (B, IN_FEATURES), dtype=jnp.float32)
    out = jax.block_until_ready(my_neural_net_forward(x, params))
    ref = _reference_forward(x, params)
    assert out.shape == (B, OUT_FEATURES)
    assert jnp.allclose(out, ref, atol=1e-5, rtol=1e-5)
    assert jnp.allclose(jnp.sum(out, axis=-1), 1.0, atol=1e-5)

    # Non-aligned batch, still a single block (block dims == array dims).
    B2 = 300
    x2 = jax.random.normal(k_x2, (B2, IN_FEATURES), dtype=jnp.float32)
    out2 = jax.block_until_ready(my_neural_net_forward(x2, params))
    ref2 = _reference_forward(x2, params)
    assert out2.shape == (B2, OUT_FEATURES)
    assert jnp.allclose(out2, ref2, atol=1e-5, rtol=1e-5)

    # Larger batch: multi-step pipelined grid (2 steps) with a partial tail
    # block (no wrapper-side pad; OOB tail lanes are masked on store).
    B3 = 2500
    x3 = jax.random.normal(k_x3, (B3, IN_FEATURES), dtype=jnp.float32)
    out3 = jax.block_until_ready(my_neural_net_forward(x3, params))
    ref3 = _reference_forward(x3, params)
    assert out3.shape == (B3, OUT_FEATURES)
    assert jnp.allclose(out3, ref3, atol=1e-5, rtol=1e-5)

    print("KERNEL_OK")
</pallas_src>

<mosaic_0001>
module attributes {stable_mosaic.version = 11 : i64} {
  func.func @_mlp_kernel(%arg0: i32, %arg1: memref<8x20xf32, #tpu.memory_space<vmem>>, %arg2: memref<20x20xf32, #tpu.memory_space<vmem>>, %arg3: memref<20x1xf32, #tpu.memory_space<vmem>>, %arg4: memref<20x20xf32, #tpu.memory_space<vmem>>, %arg5: memref<20x1xf32, #tpu.memory_space<vmem>>, %arg6: memref<2x20xf32, #tpu.memory_space<vmem>>, %arg7: memref<2x1xf32, #tpu.memory_space<vmem>>, %arg8: memref<2x8xf32, #tpu.memory_space<vmem>>) attributes {dimension_semantics = [#tpu.dimension_semantics<parallel>], iteration_bounds = array<i64: 1>, scalar_prefetch = 0 : i64, scratch_operands = 0 : i64, tpu.core_type = #tpu.core_type<tc>, window_params = [{transform_indices = @transform_0, window_bounds = array<i64: 8, 20>}, {pipeline_mode = #tpu.pipeline_mode<synchronous>, transform_indices = @transform_1, window_bounds = array<i64: 20, 20>}, {pipeline_mode = #tpu.pipeline_mode<synchronous>, transform_indices = @transform_2, window_bounds = array<i64: 20, 1>}, {pipeline_mode = #tpu.pipeline_mode<synchronous>, transform_indices = @transform_3, window_bounds = array<i64: 20, 20>}, {pipeline_mode = #tpu.pipeline_mode<synchronous>, transform_indices = @transform_4, window_bounds = array<i64: 20, 1>}, {pipeline_mode = #tpu.pipeline_mode<synchronous>, transform_indices = @transform_5, window_bounds = array<i64: 2, 20>}, {pipeline_mode = #tpu.pipeline_mode<synchronous>, transform_indices = @transform_6, window_bounds = array<i64: 2, 1>}, {transform_indices = @transform_7, window_bounds = array<i64: 2, 8>}]} {
    %c0 = arith.constant 0 : index
    %c0_0 = arith.constant 0 : index
    %0 = vector.load %arg1[%c0, %c0_0] : memref<8x20xf32, #tpu.memory_space<vmem>>, vector<8x20xf32>
    %c0_1 = arith.constant 0 : index
    %c0_2 = arith.constant 0 : index
    %1 = vector.load %arg2[%c0_1, %c0_2] : memref<20x20xf32, #tpu.memory_space<vmem>>, vector<20x20xf32>
    %cst = arith.constant dense<0.000000e+00> : vector<20x8xf32>
    %2 = tpu.matmul %1, %0, %cst {dimension_numbers = #tpu.dot_dimension_numbers<[1], [1], [0], [0], [0, 0, 1, 0], [], []>} : vector<20x20xf32>, vector<8x20xf32>, vector<20x8xf32> -> vector<20x8xf32>
    %c0_3 = arith.constant 0 : index
    %c0_4 = arith.constant 0 : index
    %3 = vector.load %arg3[%c0_3, %c0_4] : memref<20x1xf32, #tpu.memory_space<vmem>>, vector<20x1xf32>
    %4 = vector.broadcast %3 : vector<20x1xf32> to vector<20x8xf32>
    %5 = arith.addf %2, %4 : vector<20x8xf32>
    %cst_5 = arith.constant 0.000000e+00 : f32
    %6 = vector.broadcast %cst_5 : f32 to vector<20x8xf32>
    %7 = arith.maximumf %5, %6 : vector<20x8xf32>
    %c0_6 = arith.constant 0 : index
    %c0_7 = arith.constant 0 : index
    %8 = vector.load %arg4[%c0_6, %c0_7] : memref<20x20xf32, #tpu.memory_space<vmem>>, vector<20x20xf32>
    %cst_8 = arith.constant dense<0.000000e+00> : vector<20x8xf32>
    %9 = tpu.matmul %8, %7, %cst_8 {dimension_numbers = #tpu.dot_dimension_numbers<[1], [0], [0], [1], [0, 0, 1, 1], [], []>} : vector<20x20xf32>, vector<20x8xf32>, vector<20x8xf32> -> vector<20x8xf32>
    %c0_9 = arith.constant 0 : index
    %c0_10 = arith.constant 0 : index
    %10 = vector.load %arg5[%c0_9, %c0_10] : memref<20x1xf32, #tpu.memory_space<vmem>>, vector<20x1xf32>
    %11 = vector.broadcast %10 : vector<20x1xf32> to vector<20x8xf32>
    %12 = arith.addf %9, %11 : vector<20x8xf32>
    %cst_11 = arith.constant 0.000000e+00 : f32
    %13 = vector.broadcast %cst_11 : f32 to vector<20x8xf32>
    %14 = arith.maximumf %12, %13 : vector<20x8xf32>
    %c0_12 = arith.constant 0 : index
    %c0_13 = arith.constant 0 : index
    %15 = vector.load %arg6[%c0_12, %c0_13] : memref<2x20xf32, #tpu.memory_space<vmem>>, vector<2x20xf32>
    %cst_14 = arith.constant dense<0.000000e+00> : vector<2x8xf32>
    %16 = tpu.matmul %15, %14, %cst_14 {dimension_numbers = #tpu.dot_dimension_numbers<[1], [0], [0], [1], [0, 0, 1, 1], [], []>} : vector<2x20xf32>, vector<20x8xf32>, vector<2x8xf32> -> vector<2x8xf32>
    %c0_15 = arith.constant 0 : index
    %c0_16 = arith.constant 0 : index
    %17 = vector.load %arg7[%c0_15, %c0_16] : memref<2x1xf32, #tpu.memory_space<vmem>>, vector<2x1xf32>
    %18 = vector.broadcast %17 : vector<2x1xf32> to vector<2x8xf32>
    %19 = arith.addf %16, %18 : vector<2x8xf32>
    %20 = vector.extract_strided_slice %19 {offsets = [1, 0], sizes = [1, 8], strides = [1, 1]} : vector<2x8xf32> to vector<1x8xf32>
    %21 = vector.extract_strided_slice %19 {offsets = [0, 0], sizes = [1, 8], strides = [1, 1]} : vector<2x8xf32> to vector<1x8xf32>
    %22 = arith.subf %20, %21 : vector<1x8xf32>
    %cst_17 = arith.constant 0.000000e+00 : f32
    %23 = vector.broadcast %cst_17 : f32 to vector<1x8xf32>
    %24 = arith.subf %23, %22 : vector<1x8xf32>
    %25 = math.exp %24 : vector<1x8xf32>
    %cst_18 = arith.constant 1.000000e+00 : f32
    %26 = vector.broadcast %cst_18 : f32 to vector<1x8xf32>
    %27 = arith.addf %26, %25 : vector<1x8xf32>
    %cst_19 = arith.constant 1.000000e+00 : f32
    %28 = vector.broadcast %cst_19 : f32 to vector<1x8xf32>
    %29 = arith.divf %28, %27 : vector<1x8xf32>
    %30 = math.exp %22 : vector<1x8xf32>
    %cst_20 = arith.constant 1.000000e+00 : f32
    %31 = vector.broadcast %cst_20 : f32 to vector<1x8xf32>
    %32 = arith.addf %31, %30 : vector<1x8xf32>
    %cst_21 = arith.constant 1.000000e+00 : f32
    %33 = vector.broadcast %cst_21 : f32 to vector<1x8xf32>
    %34 = arith.divf %33, %32 : vector<1x8xf32>
    %c0_22 = arith.constant 0 : index
    %c0_23 = arith.constant 0 : index
    %35 = vector.load %arg8[%c0_22, %c0_23] : memref<2x8xf32, #tpu.memory_space<vmem>>, vector<1x8xf32>
    tpu.vector_store %arg8[%c0_22, %c0_23], %34 {strides = array<i32>} : memref<2x8xf32, #tpu.memory_space<vmem>>, vector<1x8xf32>,
    %c1 = arith.constant 1 : index
    %c0_24 = arith.constant 0 : index
    %36 = vector.load %arg8[%c1, %c0_24] : memref<2x8xf32, #tpu.memory_space<vmem>>, vector<1x8xf32>
    tpu.vector_store %arg8[%c1, %c0_24], %29 {strides = array<i32>} : memref<2x8xf32, #tpu.memory_space<vmem>>, vector<1x8xf32>,
    return
  }
  func.func @transform_0(%arg0: i32) -> (i32, i32) {
    %c0_i32 = arith.constant 0 : i32
    %c0_i32_0 = arith.constant 0 : i32
    return %arg0, %c0_i32 : i32, i32
  }
  func.func @transform_1(%arg0: i32) -> (i32, i32) {
    %c0_i32 = arith.constant 0 : i32
    %c0_i32_0 = arith.constant 0 : i32
    %c0_i32_1 = arith.constant 0 : i32
    return %c0_i32, %c0_i32_0 : i32, i32
  }
  func.func @transform_2(%arg0: i32) -> (i32, i32) {
    %c0_i32 = arith.constant 0 : i32
    %c0_i32_0 = arith.constant 0 : i32
    %c0_i32_1 = arith.constant 0 : i32
    return %c0_i32, %c0_i32_0 : i32, i32
  }
  func.func @transform_3(%arg0: i32) -> (i32, i32) {
    %c0_i32 = arith.constant 0 : i32
    %c0_i32_0 = arith.constant 0 : i32
    %c0_i32_1 = arith.constant 0 : i32
    return %c0_i32, %c0_i32_0 : i32, i32
  }
  func.func @transform_4(%arg0: i32) -> (i32, i32) {
    %c0_i32 = arith.constant 0 : i32
    %c0_i32_0 = arith.constant 0 : i32
    %c0_i32_1 = arith.constant 0 : i32
    return %c0_i32, %c0_i32_0 : i32, i32
  }
  func.func @transform_5(%arg0: i32) -> (i32, i32) {
    %c0_i32 = arith.constant 0 : i32
    %c0_i32_0 = arith.constant 0 : i32
    %c0_i32_1 = arith.constant 0 : i32
    return %c0_i32, %c0_i32_0 : i32, i32
  }
  func.func @transform_6(%arg0: i32) -> (i32, i32) {
    %c0_i32 = arith.constant 0 : i32
    %c0_i32_0 = arith.constant 0 : i32
    %c0_i32_1 = arith.constant 0 : i32
    return %c0_i32, %c0_i32_0 : i32, i32
  }
  func.func @transform_7(%arg0: i32) -> (i32, i32) {
    %c0_i32 = arith.constant 0 : i32
    %c0_i32_0 = arith.constant 0 : i32
    return %c0_i32, %arg0 : i32, i32
  }
}

</mosaic_0001>

<bundles_post_ra>
// kernel: tpu_custom_call.1
= control target key start
LH: loop header
LB: loop body
LE: loop exit
PB: predicated region body
PF: predicated region fallthrough
CT: control target
= control target key end

     0   :  { %12 = vsyncpa [#allocation3], 0  ;;  %s447_s0 = inlined_call_operand.hbm [shape: f32[8,20], index: 0, kind: input, shape index: {}]   ;;  %s448_s1 = inlined_call_operand.vmem [shape: f32[20,20], index: 1, kind: input, shape index: {}]   ;;  %s449_s2 = inlined_call_operand.vmem [shape: f32[20,1], index: 2, kind: input, shape index: {}]   ;;  %s450_s3 = inlined_call_operand.vmem [shape: f32[20,20], index: 3, kind: input, shape index: {}]   ;;  %s451_s4 = inlined_call_operand.vmem [shape: f32[20,1], index: 4, kind: input, shape index: {}]   ;;  %s452_s5 = inlined_call_operand.vmem [shape: f32[2,20], index: 5, kind: input, shape index: {}]   ;;  %s453_s6 = inlined_call_operand.vmem [shape: f32[2,1], index: 6, kind: input, shape index: {}]   ;;  %s454_s7 = inlined_call_operand.hbm [shape: f32[2,8], index: 7, kind: output, shape index: {}]  }
   0x1   :  { %13 = vsyncpa [#allocation4], 0  ;;  %s19_s26 = sshll.u32 %s447_s0, 4  ;;  %s342_s27 = smov [#allocation2]   ;;  %s20_s26 = int_to_ptr.hbm [resolvable:$true] %s19_s26 }
   0x2   :  { %s21_s28 = sshll.u32 %s342_s27, 4  ;;  %s22_s28 = int_to_ptr.vmem [resolvable:$true] %s21_s28 }
   0x3   :  { %24 = dma.hbm_to_vmem [thread:$0]  %s20_s26, 128, %s22_s28, [#allocation3]  }
   0x4   :  { %338 = dma.done.wait [#allocation3], 128  }
   0x5   :  { %339 = vsyncadd [#allocation3], 4294967168  ;;  %v343_v0 = vmov 0   ;;  %vm63_vm0 = vcmask 162816   ;;  %v47_v1 = vld [vmem:[%s449_s2 + $0x10] sm:$0xf] }
   0x6   :  { %279 = vset.pattern.permute.xlu0 %v343_v0  ;;  %280 = vset.pattern.permute.xlu1 %v343_v0  ;;  %v41_v2 = vld [vmem:[#allocation2] sm:$0xff]  ;;  %v44_v4 = vld [vmem:[%s448_s1 + $0x10] sm:$0xf]  ;;  %v46_v6 = vld [vmem:[%s449_s2 + $0x8] sm:$0xff]  ;;  %vm135_vm1 = vcmask 1043456   ;;  %vm242_vm6 = vcmask 58369  }
   0x7   :  { %281 = vset.pattern.permute.xlu2 %v343_v0  ;;  %60 = vperm.xlu0 %279, %v47_v1   ;;  %v42_v3 = vld [vmem:[%s448_s1] sm:$0xff]  ;;  %v110_v7 = vld [vmem:[%s451_s4 + $0x10] sm:$0xf]  ;;  %v43_v8 = vld [vmem:[%s448_s1 + $0x8] sm:$0xff]  ;;  %s252_s0 = sshll.u32 %s454_s7, 4  ;;  %s253_s0 = int_to_ptr.hbm [resolvable:$true] %s252_s0 }
   0x8   :  { %262 = vmatpush.xpose.msk.msra.mxu0 %vm63_vm0, %v41_v2  ;;  %272 = vmatpush.xpose.msk.msra.mxu1 %vm63_vm0, %v41_v2  ;;  %v45_v5 = vld [vmem:[%s449_s2] sm:$0xff]  ;;  %v109_v10 = vld [vmem:[%s451_s4 + $0x8] sm:$0xff]  ;;  %v107_v26 = vld [vmem:[%s450_s3 + $0x10] sm:$0xf] }
   0x9   :  { %50 = vperm.xlu1 %280, %v45_v5   ;;  %v169_v9 = vld [vmem:[%s453_s6] sm:$0x3]  ;;  %118 = vperm.xlu2 %281, %v109_v10   ;;  %v106_v24 = vld [vmem:[%s450_s3 + $0x8] sm:$0xff] }
   0xa   :  { %v108_v12 = vld [vmem:[%s451_s4] sm:$0xff] }
   0xb   :  { %263 = vmatmul.msk.f32.vlgmr.msra.gmra.mxu0 %vm63_vm0, %v42_v3  ;;  %265 = vmatmul.msk.f32.vlgmr.msra.gmra.mxu1 %vm63_vm0, %v44_v4  ;;  %v105_v25 = vld [vmem:[%s450_s3] sm:$0xff]  ;;  %s344_s3 = smov [#allocation5]  }
   0xc   :  { %v168_v39 = vld [vmem:[%s452_s5] sm:$0x3]  ;;  %s250_s5 = sshll.u32 %s344_s3, 4  ;;  %s251_s5 = int_to_ptr.vmem [resolvable:$true] %s250_s5 }
   0xf   :  { %55 = vperm.xlu0 %279, %v46_v6  }
  0x11   :  { %123 = vperm.xlu1 %280, %v110_v7   ;;  %113 = vperm.xlu2 %281, %v108_v12  }
  0x13   :  { %264 = vmatmul.msk.f32.gmra.mxu0 %vm63_vm0, %v43_v8 }
  0x17   :  { %172 = vperm.xlu0 %279, %v169_v9  }
  0x63   :  { %v119_v27 = vpop.permute.xlu2 %118 }
  0x6b   :  { %v114_v30 = vpop.permute.xlu2 %113 }
  0x79   :  { %v61_v11 = vpop.permute.xlu0 %60 }
  0x7b   :  { %v51_v17 = vpop.permute.xlu1 %50 }
  0x81   :  { %v56_v18 = vpop.permute.xlu0 %55 }
  0x83   :  { %v124_v29 = vpop.permute.xlu1 %123 }
  0x88   :  { %v93_v13 = vpop.f32.mrf.mxu0  ;;  %v99_v14 = vpop.f32.mrf.mxu1 }
  0x89   :  { %v100_v15 = vadd.f32 %v99_v14, %v61_v11  ;;  %v94_v20 = vadd.f32 %v93_v13, %v51_v17  ;;  %v173_v40 = vpop.permute.xlu0 %172 }
  0x8b   :  { %v104_v16 = vmax.f32 %v100_v15, 0.0  ;;  %v102_v23 = vmax.f32 %v94_v20, 0.0 }
  0x8d   :  { %266 = vmatpush.msk.msrb.mxu1 %vm135_vm1, %v104_v16  ;;  %273 = vmatpush.msk.msra.mxu3 %vm135_vm1, %v104_v16 }
  0x90   :  { %v96_v19 = vpop.f32.mrf.mxu0 }
  0x91   :  { %v97_v21 = vadd.f32 %v96_v19, %v56_v18 }
  0x93   :  { %v103_v22 = vmax.f32 %v97_v21, 0.0 }
  0x95   :  { %153 = vmatpush.msrb.mxu1 %v103_v22  ;;  %274 = vmatpush.msra.mxu3 %v103_v22 }
  0x97   :  { %154 = vmatpush.msrb.mxu1 %v102_v23  ;;  %275 = vmatpush.msra.mxu3 %v102_v23 }
  0x98   :  { %268 = vmatmul.msk.f32.vlgmr.msra.gmra.mxu3 %vm63_vm0, %v106_v24  ;;  %267 = vmatmul.msk.f32.vlgmr.msrb.gmra.mxu1 %vm63_vm0, %v105_v25 }
  0xa0   :  { %269 = vmatmul.msk.f32.gmra.mxu3 %vm63_vm0, %v107_v26 }
 0x115   :  { %v156_v31 = vpop.f32.mrf.mxu1 }
 0x116   :  { %v157_v35 = vadd.f32 %v156_v31, %v114_v30 }
 0x118   :  { %v165_v38 = vmax.f32 %v157_v35, 0.0 }
 0x11b   :  { %v159_v28 = vpop.f32.mrf.mxu3 }
 0x11c   :  { %v160_v33 = vadd.f32 %v159_v28, %v119_v27 }
 0x11e   :  { %v166_v37 = vmax.f32 %v160_v33, 0.0 }
 0x123   :  { %v162_v32 = vpop.f32.mrf.mxu3 }
 0x124   :  { %v163_v34 = vadd.f32 %v162_v32, %v124_v29 }
 0x126   :  { %v167_v36 = vmax.f32 %v163_v34, 0.0 }
 0x128   :  { %270 = vmatpush.msk.msra.mxu2 %vm135_vm1, %v167_v36 }
 0x12a   :  { %195 = vmatpush.msra.mxu2 %v166_v37 }
 0x12c   :  { %196 = vmatpush.msra.mxu2 %v165_v38 }
 0x12d   :  { %271 = vmatmul.msk.f32.vlgmr.msra.gmra.mxu2 %vm63_vm0, %v168_v39 }
 0x1b0   :  { %v198_v41 = vpop.f32.mrf.mxu2 }
 0x1b1   :  { %v199_v42 = vadd.f32 %v198_v41, %v173_v40 }
 0x1b3   :  { %v202_v43 = vrot.slane %v199_v42, 7 }
 0x1b5   :  { %v204_v44 = vsub.f32 %v199_v42, %v202_v43 }
 0x1b7   :  { %v205_v45 = vsub.f32 0.0, %v204_v44  ;;  %v224_v46 = vmul.f32 1.442695, %v204_v44 }
 0x1b9   :  { %v206_v47 = vmul.f32 1.442695, %v205_v45  ;;  %282 = vpow2.f32 %v224_v46 }
 0x1bb   :  { %284 = vpow2.f32 %v206_v47 }
 0x1bf   :  { %v283_v48 = vpop.eup %282 }
 0x1c0   :  { %v226_v49 = vadd.f32 1.0, %v283_v48 }
 0x1c1   :  { %v285_v50 = vpop.eup %284 }
 0x1c2   :  { %v208_v51 = vadd.f32 1.0, %v285_v50  ;;  %286 = vrcp.f32 %v226_v49  ;;  %v238_v57 = vand.u32 2147483648, %v226_v49  ;;  %v236_v60 = vand.u32 2147483647, %v226_v49 }
 0x1c3   :  { %vm232_vm3 = vweird.f32 %v226_v49 }
 0x1c4   :  { %288 = vrcp.f32 %v208_v51  ;;  %v220_v61 = vand.u32 2147483648, %v208_v51  ;;  %v218_v63 = vand.u32 2147483647, %v208_v51  ;;  %v239_v1 = vor.u32 1.1754944e-38, %v238_v57 }
 0x1c5   :  { %vm214_vm7 = vweird.f32 %v208_v51  ;;  %vm237_vm8 = vcmp.eq.f32.partialorder %v236_v60, 8.507059e+37 }
 0x1c6   :  { %v221_v4 = vor.u32 1.1754944e-38, %v220_v61  ;;  %vm219_vm10 = vcmp.eq.f32.partialorder %v218_v63, 8.507059e+37 }
 0x1c8   :  { %v287_v52 = vpop.eup %286 }
 0x1c9   :  { %v228_v53 = vmul.f32 %v287_v52, %v226_v49  ;;  %vm233_vm2 = vweird.f32 %v287_v52 }
 0x1ca   :  { %v289_v54 = vpop.eup %288  ;;  %vm234_vm5 = vmor %vm232_vm3, %vm233_vm2 }
 0x1cb   :  { %v210_v55 = vmul.f32 %v289_v54, %v208_v51  ;;  %v229_v56 = vsub.f32 1.0, %v228_v53  ;;  %vm215_vm4 = vweird.f32 %v289_v54 }
 0x1cc   :  { %vm216_vm9 = vmor %vm214_vm7, %vm215_vm4 }
 0x1cd   :  { %v211_v58 = vsub.f32 1.0, %v210_v55  ;;  %v230_v59 = vmul.f32 %v287_v52, %v229_v56 }
 0x1cf   :  { %v212_v62 = vmul.f32 %v289_v54, %v211_v58  ;;  %v231_v0 = vadd.f32 %v287_v52, %v230_v59 }
 0x1d1   :  { %v213_v2 = vadd.f32 %v289_v54, %v212_v62  ;;  %v235_v3 = vsel %vm234_vm5, %v287_v52, %v231_v0 }
 0x1d2   :  { %v240_v5 = vsel %vm237_vm8, %v239_v1, %v235_v3 }
 0x1d3   :  { %v217_v6 = vsel %vm216_vm9, %v289_v54, %v213_v2  ;;  %243 = vst.msk [vmem:[#allocation5 - $0x1] sm:$0x2] %vm242_vm6, %v240_v5 }
 0x1d4   :  { %v222_v7 = vsel %vm219_vm10, %v221_v4, %v217_v6 }
 0x1d5   :  { %244 = vst.msk [vmem:[#allocation5] sm:$0x2] %vm242_vm6, %v222_v7 }
 0x1d6   :  { %255 = dma.vmem_to_hbm [thread:$0]  %s251_s5, 32, %s253_s0, [#allocation4]  }
 0x1d7   :  { %340 = dma.done.wait [#allocation4], 32  }
 0x1d8   :  { %341 = vsyncadd [#allocation4], 4294967264 }
 0x1d9   :  { %260 = vsyncpa [#allocation3], 1 }
 0x1da   :  { %261 = vsyncpa [#allocation4], 1 }

</bundles_post_ra>
